<compile_context>
chip_gen: v7x
topology: tpu7x:2x2x1
jax: 0.10.0
libtpu: 0.0.40
codegen_flags: <defaults>
</compile_context>

<pallas_src>
import functools
import math

import jax
import jax.numpy as jnp
from jax.experimental import pallas as pl
from jax.experimental.pallas import tpu as pltpu


def _rmsnorm_kernel(x_ref, gain_ref, o_ref, *, eps, inv_dim):
    # x_ref:    (tm, Dp) input tile
    # gain_ref: (1,  Dp) gain vector (same block every grid step -> stays resident)
    # o_ref:    (tm, Dp) output tile
    x = x_ref[...].astype(jnp.float32)                      # single f32 copy of x
    ss = jnp.sum(x * x, axis=-1, keepdims=True)             # (tm, 1) sum of squares
    inv = jax.lax.rsqrt(ss * inv_dim + eps)                 # EUP rsqrt on (tm, 1)
    g = gain_ref[...].astype(jnp.float32)                   # (1, Dp), hoisted once/tile
    o_ref[...] = (x * inv * g).astype(o_ref.dtype)          # VPU multiplies only


def _vmem_capacity_bytes():
    try:
        return int(pltpu.get_tpu_info().vmem_capacity_bytes)
    except Exception:
        return 64 * 1024 * 1024  # conservative fallback (v7x per-TensorCore)


def _choose_row_tile(rows, d_pad, in_bytes, out_bytes, vmem_budget):
    # Per-row VMEM cost: double-buffered in + out slabs (pipeline) plus ~3x
    # f32 intermediates (f32 x, f32 result, temps).
    per_row = 2 * d_pad * (in_bytes + out_bytes) + 3 * d_pad * 4
    tm = vmem_budget // max(per_row, 1)
    tm = min(tm, 1024)                      # >=512-1024 rows already hits roofline
    rows_up = ((rows + 7) // 8) * 8
    tm = min(tm, rows_up)                   # no point tiling past the data
    tm = max(8, (tm // 8) * 8)              # sublane-aligned, floor at 8
    return tm


def rmsnorm(x, gain, eps=1e-5):
    orig_shape = x.shape
    orig_dtype = x.dtype
    dim = orig_shape[-1]
    rows = math.prod(orig_shape[:-1]) if len(orig_shape) > 1 else 1

    x2d = x.reshape(rows, dim)
    gain1d = gain.reshape(-1)

    # Lane-dense last dim: pad D up to a multiple of 128 (zeros do not change
    # the sum of squares; padded output columns are sliced off below).
    d_pad = ((dim + 127) // 128) * 128
    if d_pad != dim:
        x2d = jnp.pad(x2d, ((0, 0), (0, d_pad - dim)))
        gain1d = jnp.pad(gain1d, (0, d_pad - dim))
    gain2d = gain1d.reshape(1, d_pad)

    # VMEM-budget-aware row tile.
    vmem_cap = _vmem_capacity_bytes()
    tile_budget = min(vmem_cap // 2, 48 << 20)          # leave headroom for Mosaic
    in_bytes = x2d.dtype.itemsize
    out_bytes = jnp.zeros((), orig_dtype).dtype.itemsize
    tm = _choose_row_tile(rows, d_pad, in_bytes, out_bytes, tile_budget)

    # Robust grid for non-divisible row counts: pad rows, never blow up the tile.
    grid_m = pl.cdiv(rows, tm)
    rows_pad = grid_m * tm
    if rows_pad != rows:
        x2d = jnp.pad(x2d, ((0, rows_pad - rows), (0, 0)))

    vmem_limit = min(tile_budget + (16 << 20), max(vmem_cap - (8 << 20), 32 << 20))
    vmem_limit = max(vmem_limit, 32 << 20)

    kernel = functools.partial(_rmsnorm_kernel, eps=float(eps), inv_dim=1.0 / dim)

    out = pl.pallas_call(
        kernel,
        out_shape=jax.ShapeDtypeStruct((rows_pad, d_pad), orig_dtype),
        grid_spec=pltpu.PrefetchScalarGridSpec(
            num_scalar_prefetch=0,
            grid=(grid_m,),
            in_specs=[
                pl.BlockSpec((tm, d_pad), lambda i: (i, 0)),
                pl.BlockSpec((1, d_pad), lambda i: (0, 0)),
            ],
            out_specs=pl.BlockSpec((tm, d_pad), lambda i: (i, 0)),
        ),
        compiler_params=pltpu.CompilerParams(
            dimension_semantics=("parallel",),   # row axis shards across TCs (v7x)
            vmem_limit_bytes=int(vmem_limit),
        ),
    )(x2d, gain2d)

    out = out[:rows, :dim]
    return out.reshape(orig_shape)


if __name__ == "__main__":
    key = jax.random.PRNGKey(0)
    batch, seq, hidden = 2, 8, 32

    x = jax.random.normal(key, (batch, seq, hidden), dtype=jnp.float32)
    # deterministic parameter init (module __init__ uses ones)
    gain = jnp.ones((hidden,), dtype=jnp.float32)
    eps = 1e-5

    out = rmsnorm(x, gain, eps=eps)
    out = jax.block_until_ready(out)

    # reference check in plain JAX (matches the PyTorch forward)
    xf = x.astype(jnp.float32)
    tsum = jnp.sum(xf * xf, axis=-1)
    div = jnp.sqrt(tsum / hidden + eps)[..., None]
    ref = ((xf / div) * gain).astype(x.dtype)
    assert jnp.allclose(out, ref, atol=1e-5, rtol=1e-5), "mismatch vs reference"

    print("KERNEL_OK")
</pallas_src>

<mosaic_0001>
module attributes {stable_mosaic.version = 11 : i64} {
  func.func @_rmsnorm_kernel(%arg0: i32, %arg1: memref<16x128xf32, #tpu.memory_space<vmem>>, %arg2: memref<1x128xf32, #tpu.memory_space<vmem>>, %arg3: memref<16x128xf32, #tpu.memory_space<vmem>>) attributes {dimension_semantics = [#tpu.dimension_semantics<parallel>], iteration_bounds = array<i64: 1>, scalar_prefetch = 0 : i64, scratch_operands = 0 : i64, tpu.core_type = #tpu.core_type<tc>, window_params = [{transform_indices = @transform_0, window_bounds = array<i64: 16, 128>}, {pipeline_mode = #tpu.pipeline_mode<synchronous>, transform_indices = @transform_1, window_bounds = array<i64: 1, 128>}, {transform_indices = @transform_2, window_bounds = array<i64: 16, 128>}]} {
    %c0 = arith.constant 0 : index
    %c0_0 = arith.constant 0 : index
    %0 = vector.load %arg1[%c0, %c0_0] : memref<16x128xf32, #tpu.memory_space<vmem>>, vector<16x128xf32>
    %1 = arith.mulf %0, %0 : vector<16x128xf32>
    %cst = arith.constant dense<0.000000e+00> : vector<16xf32>
    %2 = vector.multi_reduction <add>, %1, %cst [1] : vector<16x128xf32> to vector<16xf32>
    %3 = vector.shape_cast %2 : vector<16xf32> to vector<16x1xf32>
    %cst_1 = arith.constant 3.125000e-02 : f32
    %4 = vector.broadcast %cst_1 : f32 to vector<16x1xf32>
    %5 = arith.mulf %3, %4 : vector<16x1xf32>
    %cst_2 = arith.constant 9.99999974E-6 : f32
    %6 = vector.broadcast %cst_2 : f32 to vector<16x1xf32>
    %7 = arith.addf %5, %6 : vector<16x1xf32>
    %8 = math.rsqrt %7 : vector<16x1xf32>
    %c0_3 = arith.constant 0 : index
    %c0_4 = arith.constant 0 : index
    %9 = vector.load %arg2[%c0_3, %c0_4] : memref<1x128xf32, #tpu.memory_space<vmem>>, vector<1x128xf32>
    %10 = vector.broadcast %8 : vector<16x1xf32> to vector<16x128xf32>
    %11 = arith.mulf %0, %10 : vector<16x128xf32>
    %12 = vector.broadcast %9 : vector<1x128xf32> to vector<16x128xf32>
    %13 = arith.mulf %11, %12 : vector<16x128xf32>
    %c0_5 = arith.constant 0 : index
    %c0_6 = arith.constant 0 : index
    %14 = vector.load %arg3[%c0_5, %c0_6] : memref<16x128xf32, #tpu.memory_space<vmem>>, vector<16x128xf32>
    tpu.vector_store %arg3[%c0_5, %c0_6], %13 {strides = array<i32>} : memref<16x128xf32, #tpu.memory_space<vmem>>, vector<16x128xf32>,
    return
  }
  func.func @transform_0(%arg0: i32) -> (i32, i32) {
    %c0_i32 = arith.constant 0 : i32
    %c0_i32_0 = arith.constant 0 : i32
    return %arg0, %c0_i32 : i32, i32
  }
  func.func @transform_1(%arg0: i32) -> (i32, i32) {
    %c0_i32 = arith.constant 0 : i32
    %c0_i32_0 = arith.constant 0 : i32
    %c0_i32_1 = arith.constant 0 : i32
    return %c0_i32, %c0_i32_0 : i32, i32
  }
  func.func @transform_2(%arg0: i32) -> (i32, i32) {
    %c0_i32 = arith.constant 0 : i32
    %c0_i32_0 = arith.constant 0 : i32
    return %arg0, %c0_i32 : i32, i32
  }
}

</mosaic_0001>

<bundles_post_ra>
// kernel: tpu_custom_call.1
= control target key start
LH: loop header
LB: loop body
LE: loop exit
PB: predicated region body
PF: predicated region fallthrough
CT: control target
= control target key end

     0   :  { %7 = vsyncpa [#allocation3], 0  ;;  %s179_s0 = inlined_call_operand.hbm [shape: f32[16,128], index: 0, kind: input, shape index: {}]   ;;  %s180_s1 = inlined_call_operand.vmem [shape: f32[1,128], index: 1, kind: input, shape index: {}]   ;;  %s181_s2 = inlined_call_operand.hbm [shape: f32[16,128], index: 2, kind: output, shape index: {}]  }
   0x1   :  { %8 = vsyncpa [#allocation4], 0  ;;  %s127_s9 = smov [#allocation2]   ;;  %s79_s13 = scalar_lea.hbm %s179_s0, 256 }
   0x2   :  { %s14_s10 = sshll.u32 %s127_s9, 4  ;;  %p80_p0 = scmp.ne.s32.totalorder %s179_s0, %s79_s13  ;;  %s15_s10 = int_to_ptr.vmem [resolvable:$true] %s14_s10 }
   0x3   :  { %p83_p1 = scmp.lt.u32.totalorder %s79_s13, %s179_s0 }
   0x5   :  { %p85_p2 = pnand %p83_p1, %p80_p0 }
   0x7   :  { %88 = shalt.err (!%p85_p2)
}
   0x8   :  { %s89_s18 = scalar_lea.vmem %s15_s10, 256  ;;  %p94_p4 = scmp.lt.s32.totalorder %s15_s10, %s15_s10 }
   0x9   :  { %p90_p3 = scmp.ne.s32.totalorder %s15_s10, %s89_s18  ;;  %p95_p5 = scmp.lt.s32.totalorder %s89_s18, %s89_s18 }
   0xb   :  { %p96_p6 = por %p95_p5, %p94_p4 }
   0xd   :  { %p97_p7 = pnand %p96_p6, %p90_p3 }
   0xf   :  { %100 = shalt.err (!%p97_p7)
}
  0x10   :  { %s128_s19 = smov 128   ;;  %s129_s20 = smov 8  }
  0x11   :  { %20 = dma.hbm_to_vmem [thread:$0]  %s179_s0, 256, %s15_s10, [#allocation3], %s128_s19, %s128_s19, %s129_s20  }
  0x12   :  { %123 = dma.done.wait [#allocation3], 256  }
  0x13   :  { %124 = vsyncadd [#allocation3], 4294967040  ;;  %v26_v0 = vld [vmem:[#allocation2] sm:$0xff]  ;;  %v27_v1 = vld [vmem:[#allocation2 + $0x8] sm:$0xff]  ;;  %s130_s0 = smov [#allocation5]  }
  0x14   :  { %v28_v2 = vmul.f32 %v26_v0, %v26_v0  ;;  %v29_v3 = vmul.f32 %v27_v1, %v27_v1  ;;  %v70_v11 = vld [vmem:[%s180_s1] ss:$0 sm:$0xff]  ;;  %s58_s25 = sshll.u32 %s130_s0, 4  ;;  %s59_s25 = int_to_ptr.vmem [resolvable:$true] %s58_s25 }
  0x15   :  { %s101_s26 = scalar_lea.vmem %s59_s25, 256  ;;  %p106_p9 = scmp.lt.s32.totalorder %s59_s25, %s59_s25 }
  0x16   :  { %30 = vadd.xlane.f32.xlu0 %v28_v2  ;;  %p102_p8 = scmp.ne.s32.totalorder %s59_s25, %s101_s26  ;;  %p107_p10 = scmp.lt.s32.totalorder %s101_s26, %s101_s26 }
  0x18   :  { %p108_p11 = por %p107_p10, %p106_p9 }
  0x1a   :  { %32 = vadd.xlane.f32.xlu0 %v29_v3  ;;  %p109_p12 = pnand %p108_p11, %p102_p8 }
  0xa3   :  { %v31_v4 = vpop.xlane.xlu0 %30 }
  0xa4   :  { %v34_v5 = vmul.f32 0.03125, %v31_v4 }
  0xa6   :  { %v36_v6 = vadd.f32 1e-05, %v34_v5 }
  0xa7   :  { %v33_v7 = vpop.xlane.xlu0 %32 }
  0xa8   :  { %75 = vrsqrt.f32 %v36_v6  ;;  %v35_v8 = vmul.f32 0.03125, %v33_v7 }
  0xaa   :  { %v37_v9 = vadd.f32 1e-05, %v35_v8 }
  0xac   :  { %77 = vrsqrt.f32 %v37_v9 }
  0xb2   :  { %v76_v10 = vpop.eup %75 }
  0xb3   :  { %v41_v12 = vmul.f32 %v76_v10, %v26_v0 }
  0xb5   :  { %v49_v13 = vmul.f32 %v70_v11, %v41_v12 }
  0xb6   :  { %v78_v14 = vpop.eup %77 }
  0xb7   :  { %v42_v15 = vmul.f32 %v78_v14, %v27_v1  ;;  %51 = vst [vmem:[#allocation5] sm:$0xff] %v49_v13 }
  0xb9   :  { %v50_v16 = vmul.f32 %v70_v11, %v42_v15 }
  0xbb   :  { %52 = vst [vmem:[#allocation5 + $0x8] sm:$0xff] %v50_v16 }
  0xbc   :  { %112 = shalt.err (!%p109_p12)
}
  0xbd   :  { %s113_s1 = scalar_lea.hbm %s181_s2, 256 }
  0xbe   :  { %p114_p13 = scmp.ne.s32.totalorder %s181_s2, %s113_s1  ;;  %p117_p0 = scmp.lt.u32.totalorder %s113_s1, %s181_s2 }
  0xc0   :  { %p119_p1 = pnand %p117_p0, %p114_p13 }
  0xc2   :  { %122 = shalt.err (!%p119_p1)
}
  0xc3   :  { %64 = dma.vmem_to_hbm [thread:$0]  %s59_s25, 256, %s181_s2, [#allocation4], %s128_s19, %s128_s19, %s129_s20  }
  0xc4   :  { %125 = dma.done.wait [#allocation4], 256  }
  0xc5   :  { %126 = vsyncadd [#allocation4], 4294967040 }
  0xc6   :  { %68 = vsyncpa [#allocation3], 1 }
  0xc7   :  { %69 = vsyncpa [#allocation4], 1 }

</bundles_post_ra>
